<compile_context>
chip_gen: v7x
topology: tpu7x:2x2x1
jax: 0.10.0
libtpu: 0.0.40
codegen_flags: <defaults>
</compile_context>

<pallas_src>
import functools

import jax
import jax.numpy as jnp
from jax.experimental import pallas as pl
from jax.experimental.pallas import tpu as pltpu

NUM_BLOCKS = 3
LANE = 128      # TPU lane width (last dim)
SUBLANE = 8     # TPU sublane width (second-to-last dim, f32)


def _round_up(x, m):
    return (x + m - 1) // m * m


def policy_kernel(x_ref, w1_ref, b1_ref, w2_ref, b2_ref, o_ref):
    """Fused 3x residual-MLP forward pass on one batch tile.

    x_ref : (Bt, Dp)       activations (padded, lane-dense), f32
    w1_ref: (3, Dp, Dp)    first linear of each block, already in MXU dtype
    b1_ref: (3, Dp)        f32
    w2_ref: (3, Dp, Dp)    second linear of each block, already in MXU dtype
    b2_ref: (3, Dp)        f32
    o_ref : (Bt, Dp)       f32
    """
    mxu_dtype = w1_ref.dtype                 # weights pre-cast in the wrapper
    h = x_ref[...].astype(jnp.float32)
    b1_all = b1_ref[...]                     # load all biases once (one tile)
    b2_all = b2_ref[...]

    for i in range(NUM_BLOCKS):              # static unroll; sequential dep
        w1 = w1_ref[i]                       # no in-kernel cast (review item)
        w2 = w2_ref[i]
        b1 = b1_all[i:i + 1, :]
        b2 = b2_all[i:i + 1, :]
        # MXU matmuls with bf16 (default) operands, f32 accumulation.
        y = jnp.dot(h.astype(mxu_dtype), w1,
                    preferred_element_type=jnp.float32)
        y = jnp.maximum(y + b1, 0.0)
        y = jnp.dot(y.astype(mxu_dtype), w2,
                    preferred_element_type=jnp.float32)
        y = y + b2
        # Residual add + relu kept in f32 on the VPU.
        h = jnp.maximum(h + y, 0.0)

    o_ref[...] = h.astype(o_ref.dtype)


def _param_spec(block_shape, index_map, single_buffer):
    """BlockSpec for a block-invariant (constant index_map) parameter.

    Single-buffer it when the grid actually iterates, so constant weights are
    not held twice in VMEM (v7x has only 64 MiB).
    """
    if single_buffer:
        try:
            return pl.BlockSpec(block_shape, index_map,
                                pipeline_mode=pl.Buffered(1))
        except (AttributeError, TypeError):
            pass  # older jax without pipeline_mode/Buffered: fall through
    return pl.BlockSpec(block_shape, index_map)


def prepare_params(w1, b1, w2, b2, matmul_dtype=jnp.bfloat16):
    """Pad params to lane-dense shapes and cast weights to the MXU operand
    dtype.  Call ONCE per model -- weights are static across forward calls, so
    this pad/cast HBM traffic is hoisted out of the per-call path."""
    nb, D, _ = w1.shape
    assert nb == NUM_BLOCKS
    D_pad = _round_up(D, LANE)
    pw = ((0, 0), (0, D_pad - D), (0, D_pad - D))
    pb = ((0, 0), (0, D_pad - D))
    w1_p = jnp.pad(w1.astype(jnp.float32), pw).astype(matmul_dtype)
    w2_p = jnp.pad(w2.astype(jnp.float32), pw).astype(matmul_dtype)
    b1_p = jnp.pad(b1.reshape(NUM_BLOCKS, D).astype(jnp.float32), pb)
    b2_p = jnp.pad(b2.reshape(NUM_BLOCKS, D).astype(jnp.float32), pb)
    return w1_p, b1_p, w2_p, b2_p


@jax.jit
def policy_network_forward(x, w1_p, b1_p, w2_p, b2_p):
    """Batch-tiled fused forward.  Params must come from `prepare_params`."""
    B, D = x.shape
    _, D_pad, _ = w1_p.shape

    # --- batch tile selection -------------------------------------------
    max_tile = 512 if D_pad <= 512 else 256      # bigger tiles amortize the
    b8 = _round_up(B, SUBLANE)                   # ~0.35us/step overhead
    if b8 <= SUBLANE:
        B_tile = SUBLANE                         # tiny batch: one tile
    elif b8 <= 2 * max_tile:
        # Split into >=2 tiles so the "parallel" axis can feed both v7x TCs.
        B_tile = _round_up(-(-B // 2), SUBLANE)
    else:
        B_tile = max_tile
    B_pad = _round_up(b8, B_tile)
    grid_steps = B_pad // B_tile

    # --- pad activations (fast path when already aligned) ----------------
    need_pad = (B_pad != B) or (D_pad != D)
    x_p = x.astype(jnp.float32)
    if need_pad:
        x_p = jnp.pad(x_p, ((0, B_pad - B), (0, D_pad - D)))

    # --- VMEM budget & cost hint -----------------------------------------
    mm_bytes = jnp.dtype(w1_p.dtype).itemsize
    weight_vmem = 2 * NUM_BLOCKS * D_pad * D_pad * mm_bytes
    bias_vmem = 2 * NUM_BLOCKS * D_pad * 4
    act_vmem = 2 * 2 * B_tile * D_pad * 4        # in + out, double-buffered
    vmem_limit = min(weight_vmem + bias_vmem + act_vmem + (16 << 20), 64 << 20)

    flops = 2 * 2 * NUM_BLOCKS * B_pad * D_pad * D_pad
    bytes_accessed = (2 * B_pad * D_pad * 4
                      + (w1_p.size + w2_p.size) * mm_bytes
                      + (b1_p.size + b2_p.size) * 4)
    cost = pl.CostEstimate(flops=flops, transcendentals=0,
                           bytes_accessed=bytes_accessed)

    single_buffer = grid_steps > 1

    out = pl.pallas_call(
        policy_kernel,
        out_shape=jax.ShapeDtypeStruct((B_pad, D_pad), jnp.float32),
        grid=(grid_steps,),
        in_specs=[
            # Activations: tiled over the batch grid axis.
            pl.BlockSpec((B_tile, D_pad), lambda i: (i, 0)),
            # Weights / biases: constant index_map -> VMEM-resident across all
            # batch tiles; single-buffered when the grid iterates.
            _param_spec((NUM_BLOCKS, D_pad, D_pad), lambda i: (0, 0, 0),
                        single_buffer),
            _param_spec((NUM_BLOCKS, D_pad), lambda i: (0, 0), single_buffer),
            _param_spec((NUM_BLOCKS, D_pad, D_pad), lambda i: (0, 0, 0),
                        single_buffer),
            _param_spec((NUM_BLOCKS, D_pad), lambda i: (0, 0), single_buffer),
        ],
        out_specs=pl.BlockSpec((B_tile, D_pad), lambda i: (i, 0)),
        compiler_params=pltpu.CompilerParams(
            dimension_semantics=("parallel",),   # batch tiles across TCs
            vmem_limit_bytes=vmem_limit),
        cost_estimate=cost,
    )(x_p, w1_p, b1_p, w2_p, b2_p)

    if need_pad:
        out = out[:B, :D]
    return out


def policy_network_ref(x, w1, b1, w2, b2):
    """Plain-JAX reference for correctness checking."""
    h = x.astype(jnp.float32)
    b1 = b1.reshape(NUM_BLOCKS, -1)
    b2 = b2.reshape(NUM_BLOCKS, -1)
    for i in range(NUM_BLOCKS):
        y = jnp.maximum(h @ w1[i] + b1[i], 0.0)
        y = y @ w2[i] + b2[i]
        h = jnp.maximum(h + y, 0.0)
    return h


if __name__ == "__main__":
    batch = 2
    hidden = 32  # input_size == output_size

    key = jax.random.PRNGKey(0)
    kx, k1, k2, k3, k4 = jax.random.split(key, 5)

    x = jax.random.normal(kx, (batch, hidden), dtype=jnp.float32)
    scale = 1.0 / jnp.sqrt(jnp.float32(hidden))
    w1 = jax.random.normal(k1, (NUM_BLOCKS, hidden, hidden), jnp.float32) * scale
    b1 = jax.random.normal(k2, (NUM_BLOCKS, hidden), jnp.float32) * 0.01
    w2 = jax.random.normal(k3, (NUM_BLOCKS, hidden, hidden), jnp.float32) * scale
    b2 = jax.random.normal(k4, (NUM_BLOCKS, hidden), jnp.float32) * 0.01

    ref = policy_network_ref(x, w1, b1, w2, b2)

    # Default path: bf16 MXU operands, f32 accumulation / residual.
    params_bf16 = prepare_params(w1, b1, w2, b2, matmul_dtype=jnp.bfloat16)
    out_bf16 = jax.block_until_ready(policy_network_forward(x, *params_bf16))
    assert out_bf16.shape == (batch, hidden)
    assert jnp.allclose(out_bf16, ref, atol=1e-1, rtol=1e-1), \
        "bf16 path mismatch vs reference"

    # f32-operand path for a tight numerical check against the f32 reference.
    params_f32 = prepare_params(w1, b1, w2, b2, matmul_dtype=jnp.float32)
    out_f32 = jax.block_until_ready(policy_network_forward(x, *params_f32))
    assert out_f32.shape == (batch, hidden)
    assert jnp.allclose(out_f32, ref, atol=1e-5, rtol=1e-5), \
        "f32 path mismatch vs reference"

    print("KERNEL_OK")
</pallas_src>

<mosaic_0001>
module attributes {stable_mosaic.version = 11 : i64} {
  func.func @policy_kernel(%arg0: i32, %arg1: memref<8x128xf32, #tpu.memory_space<vmem>>, %arg2: memref<3x128x128xbf16, #tpu.memory_space<vmem>>, %arg3: memref<3x128xf32, #tpu.memory_space<vmem>>, %arg4: memref<3x128x128xbf16, #tpu.memory_space<vmem>>, %arg5: memref<3x128xf32, #tpu.memory_space<vmem>>, %arg6: memref<8x128xf32, #tpu.memory_space<vmem>>) attributes {dimension_semantics = [#tpu.dimension_semantics<parallel>], iteration_bounds = array<i64: 1>, scalar_prefetch = 0 : i64, scratch_operands = 0 : i64, tpu.core_type = #tpu.core_type<tc>, window_params = [{transform_indices = @transform_0, window_bounds = array<i64: 8, 128>}, {pipeline_mode = #tpu.pipeline_mode<synchronous>, transform_indices = @transform_1, window_bounds = array<i64: 3, 128, 128>}, {pipeline_mode = #tpu.pipeline_mode<synchronous>, transform_indices = @transform_2, window_bounds = array<i64: 3, 128>}, {pipeline_mode = #tpu.pipeline_mode<synchronous>, transform_indices = @transform_3, window_bounds = array<i64: 3, 128, 128>}, {pipeline_mode = #tpu.pipeline_mode<synchronous>, transform_indices = @transform_4, window_bounds = array<i64: 3, 128>}, {transform_indices = @transform_5, window_bounds = array<i64: 8, 128>}]} {
    %c0 = arith.constant 0 : index
    %c0_0 = arith.constant 0 : index
    %0 = vector.load %arg1[%c0, %c0_0] : memref<8x128xf32, #tpu.memory_space<vmem>>, vector<8x128xf32>
    %c0_1 = arith.constant 0 : index
    %c0_2 = arith.constant 0 : index
    %1 = vector.load %arg3[%c0_1, %c0_2] : memref<3x128xf32, #tpu.memory_space<vmem>>, vector<3x128xf32>
    %c0_3 = arith.constant 0 : index
    %c0_4 = arith.constant 0 : index
    %2 = vector.load %arg5[%c0_3, %c0_4] : memref<3x128xf32, #tpu.memory_space<vmem>>, vector<3x128xf32>
    %c0_5 = arith.constant 0 : index
    %c0_6 = arith.constant 0 : index
    %c0_7 = arith.constant 0 : index
    %3 = vector.load %arg2[%c0_5, %c0_6, %c0_7] : memref<3x128x128xbf16, #tpu.memory_space<vmem>>, vector<1x128x128xbf16>
    %4 = vector.shape_cast %3 : vector<1x128x128xbf16> to vector<128x128xbf16>
    %c0_8 = arith.constant 0 : index
    %c0_9 = arith.constant 0 : index
    %c0_10 = arith.constant 0 : index
    %5 = vector.load %arg4[%c0_8, %c0_9, %c0_10] : memref<3x128x128xbf16, #tpu.memory_space<vmem>>, vector<1x128x128xbf16>
    %6 = vector.shape_cast %5 : vector<1x128x128xbf16> to vector<128x128xbf16>
    %7 = vector.extract_strided_slice %1 {offsets = [0, 0], sizes = [1, 128], strides = [1, 1]} : vector<3x128xf32> to vector<1x128xf32>
    %8 = vector.extract_strided_slice %2 {offsets = [0, 0], sizes = [1, 128], strides = [1, 1]} : vector<3x128xf32> to vector<1x128xf32>
    %9 = arith.truncf %0 : vector<8x128xf32> to vector<8x128xbf16>
    %cst = arith.constant dense<0.000000e+00> : vector<8x128xf32>
    %10 = tpu.matmul %9, %4, %cst {dimension_numbers = #tpu.dot_dimension_numbers<[1], [0], [0], [1], [0, 0, 1, 1], [], []>} : vector<8x128xbf16>, vector<128x128xbf16>, vector<8x128xf32> -> vector<8x128xf32>
    %11 = vector.broadcast %7 : vector<1x128xf32> to vector<8x128xf32>
    %12 = arith.addf %10, %11 : vector<8x128xf32>
    %cst_11 = arith.constant 0.000000e+00 : f32
    %13 = vector.broadcast %cst_11 : f32 to vector<8x128xf32>
    %14 = arith.maximumf %12, %13 : vector<8x128xf32>
    %15 = arith.truncf %14 : vector<8x128xf32> to vector<8x128xbf16>
    %cst_12 = arith.constant dense<0.000000e+00> : vector<8x128xf32>
    %16 = tpu.matmul %15, %6, %cst_12 {dimension_numbers = #tpu.dot_dimension_numbers<[1], [0], [0], [1], [0, 0, 1, 1], [], []>} : vector<8x128xbf16>, vector<128x128xbf16>, vector<8x128xf32> -> vector<8x128xf32>
    %17 = vector.broadcast %8 : vector<1x128xf32> to vector<8x128xf32>
    %18 = arith.addf %16, %17 : vector<8x128xf32>
    %19 = arith.addf %0, %18 : vector<8x128xf32>
    %cst_13 = arith.constant 0.000000e+00 : f32
    %20 = vector.broadcast %cst_13 : f32 to vector<8x128xf32>
    %21 = arith.maximumf %19, %20 : vector<8x128xf32>
    %c1 = arith.constant 1 : index
    %c0_14 = arith.constant 0 : index
    %c0_15 = arith.constant 0 : index
    %22 = vector.load %arg2[%c1, %c0_14, %c0_15] : memref<3x128x128xbf16, #tpu.memory_space<vmem>>, vector<1x128x128xbf16>
    %23 = vector.shape_cast %22 : vector<1x128x128xbf16> to vector<128x128xbf16>
    %c1_16 = arith.constant 1 : index
    %c0_17 = arith.constant 0 : index
    %c0_18 = arith.constant 0 : index
    %24 = vector.load %arg4[%c1_16, %c0_17, %c0_18] : memref<3x128x128xbf16, #tpu.memory_space<vmem>>, vector<1x128x128xbf16>
    %25 = vector.shape_cast %24 : vector<1x128x128xbf16> to vector<128x128xbf16>
    %26 = vector.extract_strided_slice %1 {offsets = [1, 0], sizes = [1, 128], strides = [1, 1]} : vector<3x128xf32> to vector<1x128xf32>
    %27 = vector.extract_strided_slice %2 {offsets = [1, 0], sizes = [1, 128], strides = [1, 1]} : vector<3x128xf32> to vector<1x128xf32>
    %28 = arith.truncf %21 : vector<8x128xf32> to vector<8x128xbf16>
    %cst_19 = arith.constant dense<0.000000e+00> : vector<8x128xf32>
    %29 = tpu.matmul %28, %23, %cst_19 {dimension_numbers = #tpu.dot_dimension_numbers<[1], [0], [0], [1], [0, 0, 1, 1], [], []>} : vector<8x128xbf16>, vector<128x128xbf16>, vector<8x128xf32> -> vector<8x128xf32>
    %30 = vector.broadcast %26 : vector<1x128xf32> to vector<8x128xf32>
    %31 = arith.addf %29, %30 : vector<8x128xf32>
    %cst_20 = arith.constant 0.000000e+00 : f32
    %32 = vector.broadcast %cst_20 : f32 to vector<8x128xf32>
    %33 = arith.maximumf %31, %32 : vector<8x128xf32>
    %34 = arith.truncf %33 : vector<8x128xf32> to vector<8x128xbf16>
    %cst_21 = arith.constant dense<0.000000e+00> : vector<8x128xf32>
    %35 = tpu.matmul %34, %25, %cst_21 {dimension_numbers = #tpu.dot_dimension_numbers<[1], [0], [0], [1], [0, 0, 1, 1], [], []>} : vector<8x128xbf16>, vector<128x128xbf16>, vector<8x128xf32> -> vector<8x128xf32>
    %36 = vector.broadcast %27 : vector<1x128xf32> to vector<8x128xf32>
    %37 = arith.addf %35, %36 : vector<8x128xf32>
    %38 = arith.addf %21, %37 : vector<8x128xf32>
    %cst_22 = arith.constant 0.000000e+00 : f32
    %39 = vector.broadcast %cst_22 : f32 to vector<8x128xf32>
    %40 = arith.maximumf %38, %39 : vector<8x128xf32>
    %c2 = arith.constant 2 : index
    %c0_23 = arith.constant 0 : index
    %c0_24 = arith.constant 0 : index
    %41 = vector.load %arg2[%c2, %c0_23, %c0_24] : memref<3x128x128xbf16, #tpu.memory_space<vmem>>, vector<1x128x128xbf16>
    %42 = vector.shape_cast %41 : vector<1x128x128xbf16> to vector<128x128xbf16>
    %c2_25 = arith.constant 2 : index
    %c0_26 = arith.constant 0 : index
    %c0_27 = arith.constant 0 : index
    %43 = vector.load %arg4[%c2_25, %c0_26, %c0_27] : memref<3x128x128xbf16, #tpu.memory_space<vmem>>, vector<1x128x128xbf16>
    %44 = vector.shape_cast %43 : vector<1x128x128xbf16> to vector<128x128xbf16>
    %45 = vector.extract_strided_slice %1 {offsets = [2, 0], sizes = [1, 128], strides = [1, 1]} : vector<3x128xf32> to vector<1x128xf32>
    %46 = vector.extract_strided_slice %2 {offsets = [2, 0], sizes = [1, 128], strides = [1, 1]} : vector<3x128xf32> to vector<1x128xf32>
    %47 = arith.truncf %40 : vector<8x128xf32> to vector<8x128xbf16>
    %cst_28 = arith.constant dense<0.000000e+00> : vector<8x128xf32>
    %48 = tpu.matmul %47, %42, %cst_28 {dimension_numbers = #tpu.dot_dimension_numbers<[1], [0], [0], [1], [0, 0, 1, 1], [], []>} : vector<8x128xbf16>, vector<128x128xbf16>, vector<8x128xf32> -> vector<8x128xf32>
    %49 = vector.broadcast %45 : vector<1x128xf32> to vector<8x128xf32>
    %50 = arith.addf %48, %49 : vector<8x128xf32>
    %cst_29 = arith.constant 0.000000e+00 : f32
    %51 = vector.broadcast %cst_29 : f32 to vector<8x128xf32>
    %52 = arith.maximumf %50, %51 : vector<8x128xf32>
    %53 = arith.truncf %52 : vector<8x128xf32> to vector<8x128xbf16>
    %cst_30 = arith.constant dense<0.000000e+00> : vector<8x128xf32>
    %54 = tpu.matmul %53, %44, %cst_30 {dimension_numbers = #tpu.dot_dimension_numbers<[1], [0], [0], [1], [0, 0, 1, 1], [], []>} : vector<8x128xbf16>, vector<128x128xbf16>, vector<8x128xf32> -> vector<8x128xf32>
    %55 = vector.broadcast %46 : vector<1x128xf32> to vector<8x128xf32>
    %56 = arith.addf %54, %55 : vector<8x128xf32>
    %57 = arith.addf %40, %56 : vector<8x128xf32>
    %cst_31 = arith.constant 0.000000e+00 : f32
    %58 = vector.broadcast %cst_31 : f32 to vector<8x128xf32>
    %59 = arith.maximumf %57, %58 : vector<8x128xf32>
    %c0_32 = arith.constant 0 : index
    %c0_33 = arith.constant 0 : index
    %60 = vector.load %arg6[%c0_32, %c0_33] : memref<8x128xf32, #tpu.memory_space<vmem>>, vector<8x128xf32>
    tpu.vector_store %arg6[%c0_32, %c0_33], %59 {strides = array<i32>} : memref<8x128xf32, #tpu.memory_space<vmem>>, vector<8x128xf32>,
    return
  }
  func.func @transform_0(%arg0: i32) -> (i32, i32) {
    %c0_i32 = arith.constant 0 : i32
    %c0_i32_0 = arith.constant 0 : i32
    return %arg0, %c0_i32 : i32, i32
  }
  func.func @transform_1(%arg0: i32) -> (i32, i32, i32) {
    %c0_i32 = arith.constant 0 : i32
    %c0_i32_0 = arith.constant 0 : i32
    %c0_i32_1 = arith.constant 0 : i32
    %c0_i32_2 = arith.constant 0 : i32
    return %c0_i32, %c0_i32_0, %c0_i32_1 : i32, i32, i32
  }
  func.func @transform_2(%arg0: i32) -> (i32, i32) {
    %c0_i32 = arith.constant 0 : i32
    %c0_i32_0 = arith.constant 0 : i32
    %c0_i32_1 = arith.constant 0 : i32
    return %c0_i32, %c0_i32_0 : i32, i32
  }
  func.func @transform_3(%arg0: i32) -> (i32, i32, i32) {
    %c0_i32 = arith.constant 0 : i32
    %c0_i32_0 = arith.constant 0 : i32
    %c0_i32_1 = arith.constant 0 : i32
    %c0_i32_2 = arith.constant 0 : i32
    return %c0_i32, %c0_i32_0, %c0_i32_1 : i32, i32, i32
  }
  func.func @transform_4(%arg0: i32) -> (i32, i32) {
    %c0_i32 = arith.constant 0 : i32
    %c0_i32_0 = arith.constant 0 : i32
    %c0_i32_1 = arith.constant 0 : i32
    return %c0_i32, %c0_i32_0 : i32, i32
  }
  func.func @transform_5(%arg0: i32) -> (i32, i32) {
    %c0_i32 = arith.constant 0 : i32
    %c0_i32_0 = arith.constant 0 : i32
    return %arg0, %c0_i32 : i32, i32
  }
}

</mosaic_0001>

<bundles_post_ra>
// kernel: policy_network_forward.1
= control target key start
LH: loop header
LB: loop body
LE: loop exit
PB: predicated region body
PF: predicated region fallthrough
CT: control target
= control target key end

     0   :  { %10 = vsyncpa [#allocation3], 0  ;;  %s1207_s0 = inlined_call_operand.vmem [shape: f32[8,128], index: 0, kind: input, shape index: {}]   ;;  %s1208_s1 = inlined_call_operand.hbm [shape: bf16[3,128,128], index: 1, kind: input, shape index: {}]   ;;  %s1209_s2 = inlined_call_operand.vmem [shape: f32[3,128], index: 2, kind: input, shape index: {}]   ;;  %s1210_s3 = inlined_call_operand.hbm [shape: bf16[3,128,128], index: 3, kind: input, shape index: {}]   ;;  %s1211_s4 = inlined_call_operand.vmem [shape: f32[3,128], index: 4, kind: input, shape index: {}]   ;;  %s1212_s5 = inlined_call_operand.vmem [shape: f32[8,128], index: 5, kind: output, shape index: {}]  }
   0x1   :  { %11 = vsyncpa [#allocation5], 0  ;;  %s1050_s18 = smov [#allocation2]   ;;  %s1002_s22 = scalar_lea.hbm %s1208_s1, 3072 }
   0x2   :  { %s19_s19 = sshll.u32 %s1050_s18, 4  ;;  %p1003_p0 = scmp.ne.s32.totalorder %s1208_s1, %s1002_s22  ;;  %s20_s19 = int_to_ptr.vmem [resolvable:$true] %s19_s19 }
   0x3   :  { %p1006_p1 = scmp.lt.u32.totalorder %s1002_s22, %s1208_s1 }
   0x5   :  { %p1008_p2 = pnand %p1006_p1, %p1003_p0 }
   0x7   :  { %1011 = shalt.err (!%p1008_p2)
}
   0x8   :  { %s1012_s27 = scalar_lea.vmem %s20_s19, 3072  ;;  %p1017_p4 = scmp.lt.s32.totalorder %s20_s19, %s20_s19 }
   0x9   :  { %p1013_p3 = scmp.ne.s32.totalorder %s20_s19, %s1012_s27  ;;  %p1018_p5 = scmp.lt.s32.totalorder %s1012_s27, %s1012_s27 }
   0xb   :  { %p1019_p6 = por %p1018_p5, %p1017_p4 }
   0xd   :  { %p1020_p7 = pnand %p1019_p6, %p1013_p3 }
   0xf   :  { %1023 = shalt.err (!%p1020_p7)
}
  0x10   :  { %s1051_s28 = smov 64   ;;  %s1052_s29 = smov 4  }
  0x11   :  { %25 = dma.hbm_to_vmem [thread:$0]  %s1208_s1, 3072, %s20_s19, [#allocation3], %s1051_s28, %s1051_s28, %s1052_s29  }
  0x12   :  { %s1053_s7 = smov [#allocation4]   ;;  %s1024_s11 = scalar_lea.hbm %s1210_s3, 3072 }
  0x13   :  { %s33_s8 = sshll.u32 %s1053_s7, 4  ;;  %p1025_p8 = scmp.ne.s32.totalorder %s1210_s3, %s1024_s11  ;;  %s34_s8 = int_to_ptr.vmem [resolvable:$true] %s33_s8 }
  0x14   :  { %p1028_p9 = scmp.lt.u32.totalorder %s1024_s11, %s1210_s3 }
  0x16   :  { %p1030_p10 = pnand %p1028_p9, %p1025_p8 }
  0x18   :  { %1033 = shalt.err (!%p1030_p10)
}
  0x19   :  { %s1034_s16 = scalar_lea.vmem %s34_s8, 3072  ;;  %p1039_p12 = scmp.lt.s32.totalorder %s34_s8, %s34_s8 }
  0x1a   :  { %p1035_p11 = scmp.ne.s32.totalorder %s34_s8, %s1034_s16  ;;  %p1040_p13 = scmp.lt.s32.totalorder %s1034_s16, %s1034_s16 }
  0x1c   :  { %p1041_p0 = por %p1040_p13, %p1039_p12 }
  0x1e   :  { %p1042_p1 = pnand %p1041_p0, %p1035_p11 }
  0x20   :  { %1045 = shalt.err (!%p1042_p1)
}
  0x21   :  { %39 = dma.hbm_to_vmem [thread:$0]  %s1210_s3, 3072, %s34_s8, [#allocation5], %s1051_s28, %s1051_s28, %s1052_s29  }
  0x22   :  { %1046 = dma.done.wait [#allocation3], 3072  }
  0x23   :  { %1047 = vsyncadd [#allocation3], 4294964224 }
  0x24   :  { %1048 = dma.done.wait [#allocation5], 3072  }
  0x25   :  { %1049 = vsyncadd [#allocation5], 4294964224  ;;  %v1054_v0 = vmov 0.0   ;;  %vm1055_vm0 = vmmov 0   ;;  %v954_v1 = vld [vmem:[#allocation2] sm:$0xff]   ;;  %v955_v2 = vld [vmem:[#allocation2 + $0x8] sm:$0xff]   ;;  %v85_v25 = vlaneseq }
  0x26   :  { %828 = vmatprep.subr.bf16.mxu0 %v1054_v0  ;;  %844 = vmatprep.mubr.msk.bf16.mxu0 %vm1055_vm0, %v1054_v0  ;;  %v956_v3 = vld [vmem:[#allocation2 + $0x10] sm:$0xff]   ;;  %v962_v4 = vld [vmem:[#allocation4] sm:$0xff]   ;;  %v957_v5 = vld [vmem:[#allocation2 + $0x18] sm:$0xff]  }
  0x27   :  { %848 = vmatprep.subr.bf16.mxu1 %v1054_v0  ;;  %864 = vmatprep.mubr.msk.bf16.mxu1 %vm1055_vm0, %v1054_v0  ;;  %v963_v6 = vld [vmem:[#allocation4 + $0x8] sm:$0xff]   ;;  %v958_v7 = vld [vmem:[#allocation2 + $0x20] sm:$0xff]   ;;  %v964_v8 = vld [vmem:[#allocation4 + $0x10] sm:$0xff]   ;;  %v1147_v26 = vshrl.u32 %v85_v25, 7 }
  0x28   :  { %829 = vmatpush3.bf16.msra.mxu0 %v954_v1  ;;  %849 = vmatpush3.bf16.msra.mxu1 %v962_v4  ;;  %v959_v9 = vld [vmem:[#allocation2 + $0x28] sm:$0xff]   ;;  %v965_v10 = vld [vmem:[#allocation4 + $0x18] sm:$0xff]   ;;  %v960_v11 = vld [vmem:[#allocation2 + $0x30] sm:$0xff]  }
  0x29   :  { %830 = vmatprep.subr.bf16.mxu0 %v1054_v0  ;;  %850 = vmatprep.subr.bf16.mxu1 %v1054_v0  ;;  %v966_v12 = vld [vmem:[#allocation4 + $0x20] sm:$0xff]   ;;  %v961_v13 = vld [vmem:[#allocation2 + $0x38] sm:$0xff]   ;;  %v967_v15 = vld [vmem:[#allocation4 + $0x28] sm:$0xff]   ;;  %v87_v27 = vsub.s32 0, %v1147_v26  ;;  %v310_v63 = vsub.s32 1, %v1147_v26 }
  0x2a   :  { %v1128_v14 = vld [vmem:[%s1207_s0] sm:$0xff]  ;;  %v968_v17 = vld [vmem:[#allocation4 + $0x30] sm:$0xff]   ;;  %v969_v18 = vld [vmem:[#allocation4 + $0x38] sm:$0xff]  }
  0x2b   :  { %v84_v16 = vpack.c.bf16 %v1128_v14, %v1128_v14  ;;  %v970_v19 = vld [vmem:[#allocation2 + $0x40] sm:$0xff]   ;;  %v971_v20 = vld [vmem:[#allocation2 + $0x48] sm:$0xff]   ;;  %v972_v21 = vld [vmem:[#allocation2 + $0x50] sm:$0xff]  }
  0x2c   :  { %831 = vmatpush3.bf16.msra.mxu0 %v955_v2  ;;  %851 = vmatpush3.bf16.msra.mxu1 %v963_v6  ;;  %v973_v22 = vld [vmem:[#allocation2 + $0x58] sm:$0xff]   ;;  %v974_v23 = vld [vmem:[#allocation2 + $0x60] sm:$0xff]   ;;  %v975_v24 = vld [vmem:[#allocation2 + $0x68] sm:$0xff]  }
  0x2d   :  { %832 = vmatprep.subr.bf16.mxu0 %v1054_v0  ;;  %852 = vmatprep.subr.bf16.mxu1 %v1054_v0  ;;  %v1153_v28 = vld [vmem:[%s1209_s2] sm:$0x7]  ;;  %v976_v37 = vld [vmem:[#allocation2 + $0x70] sm:$0xff]   ;;  %v977_v38 = vld [vmem:[#allocation2 + $0x78] sm:$0xff]  }
  0x2e   :  { %v88_v29 = vrot.slane %v1153_v28, %v87_v27  ;;  %v978_v39 = vld [vmem:[#allocation4 + $0x40] sm:$0xff]   ;;  %v979_v40 = vld [vmem:[#allocation4 + $0x48] sm:$0xff]   ;;  %v980_v41 = vld [vmem:[#allocation4 + $0x50] sm:$0xff]   ;;  %v311_v1 = vrot.slane %v1153_v28, %v310_v63 }
  0x2f   :  { %v981_v42 = vld [vmem:[#allocation4 + $0x58] sm:$0xff]   ;;  %v982_v43 = vld [vmem:[#allocation4 + $0x60] sm:$0xff]   ;;  %v983_v44 = vld [vmem:[#allocation4 + $0x68] sm:$0xff]  }
  0x30   :  { %833 = vmatpush3.bf16.msra.mxu0 %v956_v3  ;;  %853 = vmatpush3.bf16.msra.mxu1 %v964_v8  ;;  %v1169_v45 = vld [vmem:[%s1211_s4] sm:$0x7]  ;;  %v984_v55 = vld [vmem:[#allocation4 + $0x70] sm:$0xff]   ;;  %v985_v56 = vld [vmem:[#allocation4 + $0x78] sm:$0xff]  }
  0x31   :  { %834 = vmatprep.subr.bf16.mxu0 %v1054_v0  ;;  %854 = vmatprep.subr.bf16.mxu1 %v1054_v0  ;;  %v182_v46 = vrot.slane %v1169_v45, %v87_v27  ;;  %v986_v57 = vld [vmem:[#allocation2 + $0x80] sm:$0xff]   ;;  %v987_v58 = vld [vmem:[#allocation2 + $0x88] sm:$0xff]   ;;  %v988_v59 = vld [vmem:[#allocation2 + $0x90] sm:$0xff]  }
  0x32   :  { %v989_v60 = vld [vmem:[#allocation2 + $0x98] sm:$0xff]   ;;  %v990_v61 = vld [vmem:[#allocation2 + $0xa0] sm:$0xff]   ;;  %v991_v62 = vld [vmem:[#allocation2 + $0xa8] sm:$0xff]  }
  0x33   :  { %v1000_v27 = vld [vmem:[#allocation4 + $0xb0] sm:$0xff]  }
  0x34   :  { %835 = vmatpush3.bf16.msra.mxu0 %v957_v5  ;;  %855 = vmatpush3.bf16.msra.mxu1 %v965_v10  ;;  %v993_v10 = vld [vmem:[#allocation2 + $0xb8] sm:$0xff]  }
  0x35   :  { %836 = vmatprep.subr.bf16.mxu0 %v1054_v0  ;;  %856 = vmatprep.subr.bf16.mxu1 %v1054_v0 }
  0x38   :  { %837 = vmatpush3.bf16.msra.mxu0 %v958_v7  ;;  %857 = vmatpush3.bf16.msra.mxu1 %v966_v12  ;;  %v995_v12 = vld [vmem:[#allocation4 + $0x88] sm:$0xff]  }
  0x39   :  { %838 = vmatprep.subr.bf16.mxu0 %v1054_v0  ;;  %858 = vmatprep.subr.bf16.mxu1 %v1054_v0 }
  0x3c   :  { %839 = vmatpush3.bf16.msra.mxu0 %v959_v9  ;;  %859 = vmatpush3.bf16.msra.mxu1 %v967_v15  ;;  %v992_v9 = vld [vmem:[#allocation2 + $0xb0] sm:$0xff]   ;;  %v998_v15 = vld [vmem:[#allocation4 + $0xa0] sm:$0xff]  }
  0x3d   :  { %840 = vmatprep.subr.bf16.mxu0 %v1054_v0  ;;  %860 = vmatprep.subr.bf16.mxu1 %v1054_v0 }
  0x40   :  { %841 = vmatpush3.bf16.msra.mxu0 %v960_v11  ;;  %861 = vmatpush3.bf16.msra.mxu1 %v968_v17  ;;  %v994_v11 = vld [vmem:[#allocation4 + $0x80] sm:$0xff]   ;;  %v405_v17 = vrot.slane %v1169_v45, %v310_v63 }
  0x41   :  { %842 = vmatprep.subr.bf16.mxu0 %v1054_v0  ;;  %862 = vmatprep.subr.bf16.mxu1 %v1054_v0 }
  0x44   :  { %843 = vmatpush3.bf16.msra.mxu0 %v961_v13  ;;  %863 = vmatpush3.bf16.msra.mxu1 %v969_v18  ;;  %v996_v13 = vld [vmem:[#allocation4 + $0x90] sm:$0xff]  }
  0x45   :  { %868 = vmatprep.subr.bf16.mxu0 %v1054_v0  ;;  %888 = vmatprep.subr.bf16.mxu1 %v1054_v0 }
  0x47   :  { %845 = vmatmul.mubr.bf16.vlgmr.msra.gmra.mrb[0].mxu0 %v84_v16  ;;  %v999_v16 = vld [vmem:[#allocation4 + $0xa8] sm:$0xff]  }
  0x48   :  { %884 = vmatprep.mubr.msk.bf16.mxu0 %vm1055_vm0, %v1054_v0  ;;  %869 = vmatpush3.bf16.msra.mxu0 %v970_v19 }
  0x49   :  { %870 = vmatprep.subr.bf16.mxu0 %v1054_v0 }
  0x4c   :  { %871 = vmatpush3.bf16.msra.mxu0 %v971_v20 }
  0x4d   :  { %872 = vmatprep.subr.bf16.mxu0 %v1054_v0 }
  0x50   :  { %873 = vmatpush3.bf16.msra.mxu0 %v972_v21 }
  0x51   :  { %874 = vmatprep.subr.bf16.mxu0 %v1054_v0 }
  0x54   :  { %875 = vmatpush3.bf16.msra.mxu0 %v973_v22 }
  0x55   :  { %876 = vmatprep.subr.bf16.mxu0 %v1054_v0 }
  0x58   :  { %877 = vmatpush3.bf16.msra.mxu0 %v974_v23 }
  0x59   :  { %878 = vmatprep.subr.bf16.mxu0 %v1054_v0 }
  0x5c   :  { %879 = vmatpush3.bf16.msra.mxu0 %v975_v24 }
  0x5d   :  { %880 = vmatprep.subr.bf16.mxu0 %v1054_v0 }
  0x60   :  { %881 = vmatpush3.bf16.msra.mxu0 %v976_v37 }
  0x61   :  { %882 = vmatprep.subr.bf16.mxu0 %v1054_v0 }
  0x64   :  { %883 = vmatpush3.bf16.msra.mxu0 %v977_v38 }
  0x65   :  { %908 = vmatprep.subr.bf16.mxu0 %v1054_v0 }
 0x11a   :  { %v171_v30 = vpop.f32.mrb[0].mxu0 }
 0x11b   :  { %v172_v31 = vadd.f32 %v171_v30, %v88_v29  ;;  %v846_v32 = vpop.f32.mrb[1].mxu0  ;;  %v1001_v29 = vld [vmem:[#allocation4 + $0xb8] sm:$0xff]   ;;  %v533_v30 = vsub.s32 2, %v1147_v26 }
 0x11c   :  { %v174_v33 = vpop.f32.mrb[2].mxu0 }
 0x11d   :  { %v177_v34 = vmax.f32 %v172_v31, 0.0  ;;  %v847_v35 = vpop.f32.mrb[3].mxu0  ;;  %v534_v31 = vrot.slane %v1153_v28, %v533_v30 }
 0x11f   :  { %v178_v36 = vpack.c.bf16 %v177_v34, %v177_v34 }
 0x121   :  { %865 = vmatmul.mubr.bf16.vlgmr.msra.gmra.mrb[0].mxu1 %v178_v36 }
 0x122   :  { %904 = vmatprep.mubr.msk.bf16.mxu1 %vm1055_vm0, %v1054_v0  ;;  %889 = vmatpush3.bf16.msra.mxu1 %v978_v39  ;;  %v628_v39 = vrot.slane %v1169_v45, %v533_v30 }
 0x123   :  { %890 = vmatprep.subr.bf16.mxu1 %v1054_v0 }
 0x126   :  { %891 = vmatpush3.bf16.msra.mxu1 %v979_v40 }
 0x127   :  { %892 = vmatprep.subr.bf16.mxu1 %v1054_v0 }
 0x12a   :  { %893 = vmatpush3.bf16.msra.mxu1 %v980_v41 }
 0x12b   :  { %894 = vmatprep.subr.bf16.mxu1 %v1054_v0 }
 0x12e   :  { %895 = vmatpush3.bf16.msra.mxu1 %v981_v42 }
 0x12f   :  { %896 = vmatprep.subr.bf16.mxu1 %v1054_v0 }
 0x132   :  { %897 = vmatpush3.bf16.msra.mxu1 %v982_v43 }
 0x133   :  { %898 = vmatprep.subr.bf16.mxu1 %v1054_v0 }
 0x136   :  { %899 = vmatpush3.bf16.msra.mxu1 %v983_v44 }
 0x137   :  { %900 = vmatprep.subr.bf16.mxu1 %v1054_v0 }
 0x13a   :  { %901 = vmatpush3.bf16.msra.mxu1 %v984_v55 }
 0x13b   :  { %902 = vmatprep.subr.bf16.mxu1 %v1054_v0 }
 0x13e   :  { %903 = vmatpush3.bf16.msra.mxu1 %v985_v56 }
 0x13f   :  { %928 = vmatprep.subr.bf16.mxu1 %v1054_v0 }
 0x1f4   :  { %v265_v47 = vpop.f32.mrb[0].mxu1 }
 0x1f5   :  { %v266_v48 = vadd.f32 %v265_v47, %v182_v46  ;;  %v866_v49 = vpop.f32.mrb[1].mxu1 }
 0x1f6   :  { %v268_v50 = vpop.f32.mrb[2].mxu1 }
 0x1f7   :  { %v271_v51 = vadd.f32 %v266_v48, %v1128_v14  ;;  %v867_v52 = vpop.f32.mrb[3].mxu1  ;;  %v997_v14 = vld [vmem:[#allocation4 + $0x98] sm:$0xff]  }
 0x1f9   :  { %v1173_v53 = vmax.f32 %v271_v51, 0.0 }
 0x1fb   :  { %v307_v54 = vpack.c.bf16 %v1173_v53, %v1173_v53 }
 0x1fd   :  { %885 = vmatmul.mubr.bf16.vlgmr.msra.gmra.mrb[4].mxu0 %v307_v54 }
 0x1fe   :  { %924 = vmatprep.mubr.msk.bf16.mxu0 %vm1055_vm0, %v1054_v0  ;;  %909 = vmatpush3.bf16.msra.mxu0 %v986_v57 }
 0x1ff   :  { %910 = vmatprep.subr.bf16.mxu0 %v1054_v0 }
 0x202   :  { %911 = vmatpush3.bf16.msra.mxu0 %v987_v58 }
 0x203   :  { %912 = vmatprep.subr.bf16.mxu0 %v1054_v0 }
 0x206   :  { %913 = vmatpush3.bf16.msra.mxu0 %v988_v59 }
 0x207   :  { %914 = vmatprep.subr.bf16.mxu0 %v1054_v0 }
 0x20a   :  { %915 = vmatpush3.bf16.msra.mxu0 %v989_v60 }
 0x20b   :  { %916 = vmatprep.subr.bf16.mxu0 %v1054_v0 }
 0x20e   :  { %917 = vmatpush3.bf16.msra.mxu0 %v990_v61 }
 0x20f   :  { %918 = vmatprep.subr.bf16.mxu0 %v1054_v0 }
 0x212   :  { %919 = vmatpush3.bf16.msra.mxu0 %v991_v62 }
 0x213   :  { %920 = vmatprep.subr.bf16.mxu0 %v1054_v0 }
 0x216   :  { %921 = vmatpush3.bf16.msra.mxu0 %v992_v9 }
 0x217   :  { %922 = vmatprep.subr.bf16.mxu0 %v1054_v0 }
 0x21a   :  { %923 = vmatpush3.bf16.msra.mxu0 %v993_v10 }
 0x2d0   :  { %v394_v2 = vpop.f32.mrb[4].mxu0 }
 0x2d1   :  { %v395_v3 = vadd.f32 %v394_v2, %v311_v1  ;;  %v886_v4 = vpop.f32.mrb[5].mxu0 }
 0x2d2   :  { %v397_v5 = vpop.f32.mrb[6].mxu0 }
 0x2d3   :  { %v400_v6 = vmax.f32 %v395_v3, 0.0  ;;  %v887_v7 = vpop.f32.mrb[7].mxu0 }
 0x2d5   :  { %v401_v8 = vpack.c.bf16 %v400_v6, %v400_v6 }
 0x2d7   :  { %905 = vmatmul.mubr.bf16.vlgmr.msra.gmra.mrb[4].mxu1 %v401_v8 }
 0x2d8   :  { %944 = vmatprep.mubr.msk.bf16.mxu1 %vm1055_vm0, %v1054_v0  ;;  %929 = vmatpush3.bf16.msra.mxu1 %v994_v11 }
 0x2d9   :  { %930 = vmatprep.subr.bf16.mxu1 %v1054_v0 }
 0x2dc   :  { %931 = vmatpush3.bf16.msra.mxu1 %v995_v12 }
 0x2dd   :  { %932 = vmatprep.subr.bf16.mxu1 %v1054_v0 }
 0x2e0   :  { %933 = vmatpush3.bf16.msra.mxu1 %v996_v13 }
 0x2e1   :  { %934 = vmatprep.subr.bf16.mxu1 %v1054_v0 }
 0x2e4   :  { %935 = vmatpush3.bf16.msra.mxu1 %v997_v14 }
 0x2e5   :  { %936 = vmatprep.subr.bf16.mxu1 %v1054_v0 }
 0x2e8   :  { %937 = vmatpush3.bf16.msra.mxu1 %v998_v15 }
 0x2e9   :  { %938 = vmatprep.subr.bf16.mxu1 %v1054_v0 }
 0x2ec   :  { %939 = vmatpush3.bf16.msra.mxu1 %v999_v16 }
 0x2ed   :  { %940 = vmatprep.subr.bf16.mxu1 %v1054_v0 }
 0x2f0   :  { %941 = vmatpush3.bf16.msra.mxu1 %v1000_v27 }
 0x2f1   :  { %942 = vmatprep.subr.bf16.mxu1 %v1054_v0 }
 0x2f4   :  { %943 = vmatpush3.bf16.msra.mxu1 %v1001_v29 }
 0x3aa   :  { %v488_v18 = vpop.f32.mrb[4].mxu1 }
 0x3ab   :  { %v489_v19 = vadd.f32 %v488_v18, %v405_v17  ;;  %v906_v20 = vpop.f32.mrb[5].mxu1 }
 0x3ac   :  { %v491_v21 = vpop.f32.mrb[6].mxu1 }
 0x3ad   :  { %v494_v22 = vadd.f32 %v489_v19, %v1173_v53  ;;  %v907_v23 = vpop.f32.mrb[7].mxu1 }
 0x3af   :  { %v495_v24 = vmax.f32 %v494_v22, 0.0 }
 0x3b1   :  { %v530_v25 = vpack.c.bf16 %v495_v24, %v495_v24 }
 0x3b3   :  { %925 = vmatmul.mubr.bf16.vlgmr.msra.gmra.mrb[8].mxu0 %v530_v25 }
 0x486   :  { %v617_v32 = vpop.f32.mrb[8].mxu0 }
 0x487   :  { %v618_v33 = vadd.f32 %v617_v32, %v534_v31  ;;  %v926_v34 = vpop.f32.mrb[9].mxu0 }
 0x488   :  { %v620_v35 = vpop.f32.mrb[10].mxu0 }
 0x489   :  { %v623_v36 = vmax.f32 %v618_v33, 0.0  ;;  %v927_v37 = vpop.f32.mrb[11].mxu0 }
 0x48b   :  { %v624_v38 = vpack.c.bf16 %v623_v36, %v623_v36 }
 0x48d   :  { %945 = vmatmul.mubr.bf16.vlgmr.msra.gmra.mrb[8].mxu1 %v624_v38 }
 0x560   :  { %v711_v40 = vpop.f32.mrb[8].mxu1 }
 0x561   :  { %v712_v41 = vadd.f32 %v711_v40, %v628_v39  ;;  %v946_v42 = vpop.f32.mrb[9].mxu1 }
 0x562   :  { %v714_v0 = vpop.f32.mrb[10].mxu1 }
 0x563   :  { %v717_v43 = vadd.f32 %v712_v41, %v495_v24  ;;  %v947_v44 = vpop.f32.mrb[11].mxu1 }
 0x565   :  { %v718_v46 = vmax.f32 %v717_v43, 0.0 }
 0x567   :  { %719 = vst [vmem:[%s1212_s5] sm:$0xff] %v718_v46 }
 0x568   :  { %724 = vsyncpa [#allocation3], 1 }
 0x569   :  { %725 = vsyncpa [#allocation5], 1 }

</bundles_post_ra>
